<compile_context>
chip_gen: v7x
topology: tpu7x:2x2x1
jax: 0.10.0
libtpu: 0.0.40
codegen_flags: <defaults>
</compile_context>

<pallas_src>
import jax
import jax.numpy as jnp
from jax.experimental import pallas as pl
from jax.experimental.pallas import tpu as pltpu


def _fused_conv_kernel(p_ref, w_ref, b_ref, o_ref):
    # p_ref: (3, B, K, HW)   im2col patches per conv / batch (K = 9*Cin)
    # w_ref: (3, Cout, K)    flattened conv weights
    # b_ref: (3, Cout, 1)    biases
    # o_ref: (3, B*Cout, HW) output, row index = b*Cout + cout  (full (8,128) tiles)
    n_conv, B, K, HW = p_ref.shape
    Cout = w_ref.shape[1]
    for c in range(n_conv):
        w = w_ref[c]        # (Cout, K)
        bias = b_ref[c]     # (Cout, 1) -> broadcasts over HW
        outs = [
            jnp.dot(w, p_ref[c, b], preferred_element_type=jnp.float32) + bias
            for b in range(B)
        ]
        # Pack both batches into one sublane-dense (B*Cout, HW) store.
        o_ref[c] = jnp.concatenate(outs, axis=0).astype(o_ref.dtype)


def _fused_forward(x_ref, x_over, x_under, w_stack, b_stack):
    """Runs the three 3x3 (padding=1, bias) convs as one fused Pallas call.

    x_*:     (B, Cin, H, W)       NCHW, all three same shape
    w_stack: (3, Cout, Cin, 3, 3) PyTorch OIHW weights stacked per conv
    b_stack: (3, Cout)
    returns three (B, Cout, H, W) arrays.
    """
    B, Cin, H, W = x_ref.shape
    n_conv, Cout = w_stack.shape[0], w_stack.shape[1]
    HW = H * W
    K = 9 * Cin

    # ---- wrapper-side prep (fuses under the enclosing jax.jit) ----
    x_all = jnp.stack([x_ref, x_over, x_under], axis=0)            # (3,B,Cin,H,W)
    x_pad = jnp.pad(x_all, ((0, 0), (0, 0), (0, 0), (1, 1), (1, 1)))

    # im2col: tap index t = kh*3 + kw, patch row index = t*Cin + c
    taps = jnp.stack(
        [x_pad[:, :, :, kh:kh + H, kw:kw + W]
         for kh in range(3) for kw in range(3)],
        axis=2)                                                     # (3,B,9,Cin,H,W)
    patches = taps.reshape(n_conv, B, K, HW)                        # (3,B,K,HW)

    # weights: (3,Cout,Cin,3,3) -> (3,Cout,3,3,Cin) -> (3,Cout,9*Cin)
    # so the flattened K index matches the patches' t*Cin + c ordering.
    w_mat = jnp.transpose(w_stack, (0, 1, 3, 4, 2)).reshape(n_conv, Cout, K)
    b_col = b_stack[:, :, None]                                     # (3,Cout,1)

    # ---- single Pallas invocation; everything lives in VMEM for one step ----
    out = pl.pallas_call(
        _fused_conv_kernel,
        out_shape=jax.ShapeDtypeStruct((n_conv, B * Cout, HW), x_ref.dtype),
        grid_spec=pltpu.PrefetchScalarGridSpec(
            num_scalar_prefetch=0,
            grid=(1,),
            in_specs=[
                pl.BlockSpec((n_conv, B, K, HW), lambda i: (0, 0, 0, 0)),
                pl.BlockSpec((n_conv, Cout, K), lambda i: (0, 0, 0)),
                pl.BlockSpec((n_conv, Cout, 1), lambda i: (0, 0, 0)),
            ],
            out_specs=pl.BlockSpec((n_conv, B * Cout, HW), lambda i: (0, 0, 0)),
        ),
        compiler_params=pltpu.CompilerParams(
            dimension_semantics=("arbitrary",)),
    )(patches, w_mat, b_col)

    # (3, B*Cout, H*W) -> (3, B, Cout, H, W): already NCHW, no transpose.
    out = out.reshape(n_conv, B, Cout, H, W)
    return out[0], out[1], out[2]


class TestFlopsPallas:
    """JAX/Pallas equivalent of the PyTorch `test_flops` module."""

    def __init__(self, in_planes, out_planes, key):
        k = jax.random.split(key, 6)
        fan_in = in_planes * 3 * 3
        bound = 1.0 / jnp.sqrt(fan_in)

        ws, bs = [], []
        for i in range(3):
            ws.append(jax.random.uniform(k[2 * i], (out_planes, in_planes, 3, 3),
                                         jnp.float32, -bound, bound))
            bs.append(jax.random.uniform(k[2 * i + 1], (out_planes,),
                                         jnp.float32, -bound, bound))
        self.w_stack = jnp.stack(ws)   # (3, Cout, Cin, 3, 3)
        self.b_stack = jnp.stack(bs)   # (3, Cout)
        self._fwd = jax.jit(_fused_forward)

    def __call__(self, x_ref, x_over, x_under):
        return self._fwd(x_ref, x_over, x_under, self.w_stack, self.b_stack)


def _reference_conv(x, w, b):
    # Pure-JAX reference (NCHW, padding=1) for correctness check.
    out = jax.lax.conv_general_dilated(
        x, w, window_strides=(1, 1), padding=((1, 1), (1, 1)),
        dimension_numbers=("NCHW", "OIHW", "NCHW"))
    return out + b[None, :, None, None]


if __name__ == "__main__":
    key = jax.random.PRNGKey(0)
    k_params, k1, k2, k3 = jax.random.split(key, 4)

    B, Cin, Cout, H, W = 2, 4, 4, 16, 16
    x_ref = jax.random.normal(k1, (B, Cin, H, W), jnp.float32)
    x_over = jax.random.normal(k2, (B, Cin, H, W), jnp.float32)
    x_under = jax.random.normal(k3, (B, Cin, H, W), jnp.float32)

    model = TestFlopsPallas(Cin, Cout, k_params)
    feat1, feat2, feat3 = model(x_ref, x_over, x_under)
    jax.block_until_ready((feat1, feat2, feat3))

    # Sanity check against pure-JAX conv.
    r1 = _reference_conv(x_ref, model.w_stack[0], model.b_stack[0])
    r2 = _reference_conv(x_over, model.w_stack[1], model.b_stack[1])
    r3 = _reference_conv(x_under, model.w_stack[2], model.b_stack[2])
    assert jnp.allclose(feat1, r1, atol=1e-4, rtol=1e-4)
    assert jnp.allclose(feat2, r2, atol=1e-4, rtol=1e-4)
    assert jnp.allclose(feat3, r3, atol=1e-4, rtol=1e-4)

    print("KERNEL_OK")
</pallas_src>

<mosaic_0001>
module attributes {stable_mosaic.version = 11 : i64} {
  func.func @_fused_conv_kernel(%arg0: i32, %arg1: memref<3x2x36x256xf32, #tpu.memory_space<vmem>>, %arg2: memref<3x4x36xf32, #tpu.memory_space<vmem>>, %arg3: memref<3x4x1xf32, #tpu.memory_space<vmem>>, %arg4: memref<3x8x256xf32, #tpu.memory_space<vmem>>) attributes {dimension_semantics = [#tpu.dimension_semantics<arbitrary>], iteration_bounds = array<i64: 1>, scalar_prefetch = 0 : i64, scratch_operands = 0 : i64, tpu.core_type = #tpu.core_type<tc>, window_params = [{pipeline_mode = #tpu.pipeline_mode<synchronous>, transform_indices = @transform_0, window_bounds = array<i64: 3, 2, 36, 256>}, {pipeline_mode = #tpu.pipeline_mode<synchronous>, transform_indices = @transform_1, window_bounds = array<i64: 3, 4, 36>}, {pipeline_mode = #tpu.pipeline_mode<synchronous>, transform_indices = @transform_2, window_bounds = array<i64: 3, 4, 1>}, {pipeline_mode = #tpu.pipeline_mode<synchronous>, transform_indices = @transform_3, window_bounds = array<i64: 3, 8, 256>}]} {
    %c0 = arith.constant 0 : index
    %c0_0 = arith.constant 0 : index
    %c0_1 = arith.constant 0 : index
    %0 = vector.load %arg2[%c0, %c0_0, %c0_1] : memref<3x4x36xf32, #tpu.memory_space<vmem>>, vector<1x4x36xf32>
    %1 = vector.shape_cast %0 : vector<1x4x36xf32> to vector<4x36xf32>
    %c0_2 = arith.constant 0 : index
    %c0_3 = arith.constant 0 : index
    %c0_4 = arith.constant 0 : index
    %2 = vector.load %arg3[%c0_2, %c0_3, %c0_4] : memref<3x4x1xf32, #tpu.memory_space<vmem>>, vector<1x4x1xf32>
    %3 = vector.shape_cast %2 : vector<1x4x1xf32> to vector<4x1xf32>
    %c0_5 = arith.constant 0 : index
    %c0_6 = arith.constant 0 : index
    %c0_7 = arith.constant 0 : index
    %c0_8 = arith.constant 0 : index
    %4 = vector.load %arg1[%c0_5, %c0_6, %c0_7, %c0_8] : memref<3x2x36x256xf32, #tpu.memory_space<vmem>>, vector<1x1x36x256xf32>
    %5 = vector.shape_cast %4 : vector<1x1x36x256xf32> to vector<36x256xf32>
    %cst = arith.constant dense<0.000000e+00> : vector<4x256xf32>
    %6 = tpu.matmul %1, %5, %cst {dimension_numbers = #tpu.dot_dimension_numbers<[1], [0], [0], [1], [0, 0, 1, 1], [], []>} : vector<4x36xf32>, vector<36x256xf32>, vector<4x256xf32> -> vector<4x256xf32>
    %7 = vector.broadcast %3 : vector<4x1xf32> to vector<4x256xf32>
    %8 = arith.addf %6, %7 : vector<4x256xf32>
    %c0_9 = arith.constant 0 : index
    %c1 = arith.constant 1 : index
    %c0_10 = arith.constant 0 : index
    %c0_11 = arith.constant 0 : index
    %9 = vector.load %arg1[%c0_9, %c1, %c0_10, %c0_11] : memref<3x2x36x256xf32, #tpu.memory_space<vmem>>, vector<1x1x36x256xf32>
    %10 = vector.shape_cast %9 : vector<1x1x36x256xf32> to vector<36x256xf32>
    %cst_12 = arith.constant dense<0.000000e+00> : vector<4x256xf32>
    %11 = tpu.matmul %1, %10, %cst_12 {dimension_numbers = #tpu.dot_dimension_numbers<[1], [0], [0], [1], [0, 0, 1, 1], [], []>} : vector<4x36xf32>, vector<36x256xf32>, vector<4x256xf32> -> vector<4x256xf32>
    %12 = vector.broadcast %3 : vector<4x1xf32> to vector<4x256xf32>
    %13 = arith.addf %11, %12 : vector<4x256xf32>
    %14 = tpu.concatenate %8, %13 in 0 : vector<4x256xf32>, vector<4x256xf32> -> vector<8x256xf32>
    %c0_13 = arith.constant 0 : index
    %c0_14 = arith.constant 0 : index
    %c0_15 = arith.constant 0 : index
    %15 = vector.load %arg4[%c0_13, %c0_14, %c0_15] : memref<3x8x256xf32, #tpu.memory_space<vmem>>, vector<1x8x256xf32>
    %16 = vector.shape_cast %15 : vector<1x8x256xf32> to vector<8x256xf32>
    %17 = vector.shape_cast %14 : vector<8x256xf32> to vector<1x8x256xf32>
    tpu.vector_store %arg4[%c0_13, %c0_14, %c0_15], %17 {strides = array<i32>} : memref<3x8x256xf32, #tpu.memory_space<vmem>>, vector<1x8x256xf32>,
    %c1_16 = arith.constant 1 : index
    %c0_17 = arith.constant 0 : index
    %c0_18 = arith.constant 0 : index
    %18 = vector.load %arg2[%c1_16, %c0_17, %c0_18] : memref<3x4x36xf32, #tpu.memory_space<vmem>>, vector<1x4x36xf32>
    %19 = vector.shape_cast %18 : vector<1x4x36xf32> to vector<4x36xf32>
    %c1_19 = arith.constant 1 : index
    %c0_20 = arith.constant 0 : index
    %c0_21 = arith.constant 0 : index
    %20 = vector.load %arg3[%c1_19, %c0_20, %c0_21] : memref<3x4x1xf32, #tpu.memory_space<vmem>>, vector<1x4x1xf32>
    %21 = vector.shape_cast %20 : vector<1x4x1xf32> to vector<4x1xf32>
    %c1_22 = arith.constant 1 : index
    %c0_23 = arith.constant 0 : index
    %c0_24 = arith.constant 0 : index
    %c0_25 = arith.constant 0 : index
    %22 = vector.load %arg1[%c1_22, %c0_23, %c0_24, %c0_25] : memref<3x2x36x256xf32, #tpu.memory_space<vmem>>, vector<1x1x36x256xf32>
    %23 = vector.shape_cast %22 : vector<1x1x36x256xf32> to vector<36x256xf32>
    %cst_26 = arith.constant dense<0.000000e+00> : vector<4x256xf32>
    %24 = tpu.matmul %19, %23, %cst_26 {dimension_numbers = #tpu.dot_dimension_numbers<[1], [0], [0], [1], [0, 0, 1, 1], [], []>} : vector<4x36xf32>, vector<36x256xf32>, vector<4x256xf32> -> vector<4x256xf32>
    %25 = vector.broadcast %21 : vector<4x1xf32> to vector<4x256xf32>
    %26 = arith.addf %24, %25 : vector<4x256xf32>
    %c1_27 = arith.constant 1 : index
    %c1_28 = arith.constant 1 : index
    %c0_29 = arith.constant 0 : index
    %c0_30 = arith.constant 0 : index
    %27 = vector.load %arg1[%c1_27, %c1_28, %c0_29, %c0_30] : memref<3x2x36x256xf32, #tpu.memory_space<vmem>>, vector<1x1x36x256xf32>
    %28 = vector.shape_cast %27 : vector<1x1x36x256xf32> to vector<36x256xf32>
    %cst_31 = arith.constant dense<0.000000e+00> : vector<4x256xf32>
    %29 = tpu.matmul %19, %28, %cst_31 {dimension_numbers = #tpu.dot_dimension_numbers<[1], [0], [0], [1], [0, 0, 1, 1], [], []>} : vector<4x36xf32>, vector<36x256xf32>, vector<4x256xf32> -> vector<4x256xf32>
    %30 = vector.broadcast %21 : vector<4x1xf32> to vector<4x256xf32>
    %31 = arith.addf %29, %30 : vector<4x256xf32>
    %32 = tpu.concatenate %26, %31 in 0 : vector<4x256xf32>, vector<4x256xf32> -> vector<8x256xf32>
    %c1_32 = arith.constant 1 : index
    %c0_33 = arith.constant 0 : index
    %c0_34 = arith.constant 0 : index
    %33 = vector.load %arg4[%c1_32, %c0_33, %c0_34] : memref<3x8x256xf32, #tpu.memory_space<vmem>>, vector<1x8x256xf32>
    %34 = vector.shape_cast %33 : vector<1x8x256xf32> to vector<8x256xf32>
    %35 = vector.shape_cast %32 : vector<8x256xf32> to vector<1x8x256xf32>
    tpu.vector_store %arg4[%c1_32, %c0_33, %c0_34], %35 {strides = array<i32>} : memref<3x8x256xf32, #tpu.memory_space<vmem>>, vector<1x8x256xf32>,
    %c2 = arith.constant 2 : index
    %c0_35 = arith.constant 0 : index
    %c0_36 = arith.constant 0 : index
    %36 = vector.load %arg2[%c2, %c0_35, %c0_36] : memref<3x4x36xf32, #tpu.memory_space<vmem>>, vector<1x4x36xf32>
    %37 = vector.shape_cast %36 : vector<1x4x36xf32> to vector<4x36xf32>
    %c2_37 = arith.constant 2 : index
    %c0_38 = arith.constant 0 : index
    %c0_39 = arith.constant 0 : index
    %38 = vector.load %arg3[%c2_37, %c0_38, %c0_39] : memref<3x4x1xf32, #tpu.memory_space<vmem>>, vector<1x4x1xf32>
    %39 = vector.shape_cast %38 : vector<1x4x1xf32> to vector<4x1xf32>
    %c2_40 = arith.constant 2 : index
    %c0_41 = arith.constant 0 : index
    %c0_42 = arith.constant 0 : index
    %c0_43 = arith.constant 0 : index
    %40 = vector.load %arg1[%c2_40, %c0_41, %c0_42, %c0_43] : memref<3x2x36x256xf32, #tpu.memory_space<vmem>>, vector<1x1x36x256xf32>
    %41 = vector.shape_cast %40 : vector<1x1x36x256xf32> to vector<36x256xf32>
    %cst_44 = arith.constant dense<0.000000e+00> : vector<4x256xf32>
    %42 = tpu.matmul %37, %41, %cst_44 {dimension_numbers = #tpu.dot_dimension_numbers<[1], [0], [0], [1], [0, 0, 1, 1], [], []>} : vector<4x36xf32>, vector<36x256xf32>, vector<4x256xf32> -> vector<4x256xf32>
    %43 = vector.broadcast %39 : vector<4x1xf32> to vector<4x256xf32>
    %44 = arith.addf %42, %43 : vector<4x256xf32>
    %c2_45 = arith.constant 2 : index
    %c1_46 = arith.constant 1 : index
    %c0_47 = arith.constant 0 : index
    %c0_48 = arith.constant 0 : index
    %45 = vector.load %arg1[%c2_45, %c1_46, %c0_47, %c0_48] : memref<3x2x36x256xf32, #tpu.memory_space<vmem>>, vector<1x1x36x256xf32>
    %46 = vector.shape_cast %45 : vector<1x1x36x256xf32> to vector<36x256xf32>
    %cst_49 = arith.constant dense<0.000000e+00> : vector<4x256xf32>
    %47 = tpu.matmul %37, %46, %cst_49 {dimension_numbers = #tpu.dot_dimension_numbers<[1], [0], [0], [1], [0, 0, 1, 1], [], []>} : vector<4x36xf32>, vector<36x256xf32>, vector<4x256xf32> -> vector<4x256xf32>
    %48 = vector.broadcast %39 : vector<4x1xf32> to vector<4x256xf32>
    %49 = arith.addf %47, %48 : vector<4x256xf32>
    %50 = tpu.concatenate %44, %49 in 0 : vector<4x256xf32>, vector<4x256xf32> -> vector<8x256xf32>
    %c2_50 = arith.constant 2 : index
    %c0_51 = arith.constant 0 : index
    %c0_52 = arith.constant 0 : index
    %51 = vector.load %arg4[%c2_50, %c0_51, %c0_52] : memref<3x8x256xf32, #tpu.memory_space<vmem>>, vector<1x8x256xf32>
    %52 = vector.shape_cast %51 : vector<1x8x256xf32> to vector<8x256xf32>
    %53 = vector.shape_cast %50 : vector<8x256xf32> to vector<1x8x256xf32>
    tpu.vector_store %arg4[%c2_50, %c0_51, %c0_52], %53 {strides = array<i32>} : memref<3x8x256xf32, #tpu.memory_space<vmem>>, vector<1x8x256xf32>,
    return
  }
  func.func @transform_0(%arg0: i32) -> (i32, i32, i32, i32) {
    %c0_i32 = arith.constant 0 : i32
    %c0_i32_0 = arith.constant 0 : i32
    %c0_i32_1 = arith.constant 0 : i32
    %c0_i32_2 = arith.constant 0 : i32
    %c0_i32_3 = arith.constant 0 : i32
    return %c0_i32, %c0_i32_0, %c0_i32_1, %c0_i32_2 : i32, i32, i32, i32
  }
  func.func @transform_1(%arg0: i32) -> (i32, i32, i32) {
    %c0_i32 = arith.constant 0 : i32
    %c0_i32_0 = arith.constant 0 : i32
    %c0_i32_1 = arith.constant 0 : i32
    %c0_i32_2 = arith.constant 0 : i32
    return %c0_i32, %c0_i32_0, %c0_i32_1 : i32, i32, i32
  }
  func.func @transform_2(%arg0: i32) -> (i32, i32, i32) {
    %c0_i32 = arith.constant 0 : i32
    %c0_i32_0 = arith.constant 0 : i32
    %c0_i32_1 = arith.constant 0 : i32
    %c0_i32_2 = arith.constant 0 : i32
    return %c0_i32, %c0_i32_0, %c0_i32_1 : i32, i32, i32
  }
  func.func @transform_3(%arg0: i32) -> (i32, i32, i32) {
    %c0_i32 = arith.constant 0 : i32
    %c0_i32_0 = arith.constant 0 : i32
    %c0_i32_1 = arith.constant 0 : i32
    %c0_i32_2 = arith.constant 0 : i32
    return %c0_i32, %c0_i32_0, %c0_i32_1 : i32, i32, i32
  }
}

</mosaic_0001>

<bundles_post_ra>
// kernel: squeeze.3
= control target key start
LH: loop header
LB: loop body
LE: loop exit
PB: predicated region body
PF: predicated region fallthrough
CT: control target
= control target key end

     0   :  { %s189_s8 = smov 96   ;;  %s190_s9 = smov 112   ;;  %s267_s0 = inlined_call_operand.vmem [shape: f32[1,8,256], index: 0, kind: input, shape index: {}]   ;;  %s268_s1 = inlined_call_operand.hbm [shape: f32[2,4,16,16], index: 1, kind: output, shape index: {}]  }
   0x1   :  { %v37_v0 = vld.sshfl [vmem:[%s267_s0] sm:$0xff pattern:$0xb3a29180]   ;;  %v151_v1 = vld.sshfl [vmem:[%s267_s0 + $0x4] sm:$0xff pattern:$0xb3a29180]  }
   0x2   :  { %38 = vrot.lane.b32.xlu1 %v37_v0, %s189_s8  ;;  %21 = vrot.lane.b32.xlu0 %v37_v0, %s190_s9 }
   0x3   :  { %2 = vsyncpa [#allocation1], 0  ;;  %s191_s12 = smov 80   ;;  %vm4_vm0 = vcmask 130048   ;;  %v3_v2 = vld [vmem:[%s267_s0] sm:$0xff]   ;;  %v149_v3 = vld [vmem:[%s267_s0 + $0x8] sm:$0xff]  }
   0x4   :  { %5 = vst.msk [vmem:[#allocation0] ss:$16 sm:$0x3] %vm4_vm0, %v3_v2   ;;  %6 = vst.msk [vmem:[#allocation0] ss:$16 sm:$0xc] %vm4_vm0, %v3_v2  }
   0x5   :  { %7 = vst.msk [vmem:[#allocation0] ss:$16 sm:$0x30] %vm4_vm0, %v3_v2   ;;  %8 = vst.msk [vmem:[#allocation0] ss:$16 sm:$0xc0] %vm4_vm0, %v3_v2  }
   0x6   :  { %47 = vrot.lane.b32.xlu1 %v151_v1, %s189_s8  ;;  %30 = vrot.lane.b32.xlu0 %v151_v1, %s190_s9  ;;  %13 = vst.msk [vmem:[#allocation0 + $0x8] ss:$16 sm:$0x3] %vm4_vm0, %v149_v3   ;;  %15 = vst.msk [vmem:[#allocation0 + $0x8] ss:$16 sm:$0xc] %vm4_vm0, %v149_v3  }
   0x7   :  { %17 = vst.msk [vmem:[#allocation0 + $0x8] ss:$16 sm:$0x30] %vm4_vm0, %v149_v3   ;;  %19 = vst.msk [vmem:[#allocation0 + $0x8] ss:$16 sm:$0xc0] %vm4_vm0, %v149_v3  }
   0x8   :  { %s192_s0 = smov 64   ;;  %s193_s17 = smov 48  }
   0x9   :  { %s194_s18 = smov 32   ;;  %s195_s19 = smov 16  }
   0xa   :  { %64 = vrot.lane.b32.xlu1 %v151_v1, %s191_s12  ;;  %55 = vrot.lane.b32.xlu0 %v37_v0, %s191_s12  ;;  %s196_s20 = smov [#allocation0]  }
   0xb   :  { %s143_s21 = sshll.u32 %s196_s20, 4  ;;  %s144_s21 = int_to_ptr.vmem [resolvable:$true] %s143_s21 }
   0xc   :  { %s165_s22 = scalar_lea.vmem %s144_s21, 2048  ;;  %p170_p1 = scmp.lt.s32.totalorder %s144_s21, %s144_s21 }
   0xd   :  { %p166_p0 = scmp.ne.s32.totalorder %s144_s21, %s165_s22  ;;  %p171_p2 = scmp.lt.s32.totalorder %s165_s22, %s165_s22 }
   0xe   :  { %81 = vrot.lane.b32.xlu1 %v151_v1, %s192_s0  ;;  %72 = vrot.lane.b32.xlu0 %v37_v0, %s192_s0 }
   0xf   :  { %p172_p3 = por %p171_p2, %p170_p1 }
  0x11   :  { %p173_p4 = pnand %p172_p3, %p166_p0 }
  0x12   :  { %98 = vrot.lane.b32.xlu1 %v151_v1, %s193_s17  ;;  %89 = vrot.lane.b32.xlu0 %v37_v0, %s193_s17 }
  0x16   :  { %115 = vrot.lane.b32.xlu1 %v151_v1, %s194_s18  ;;  %106 = vrot.lane.b32.xlu0 %v37_v0, %s194_s18 }
  0x1a   :  { %132 = vrot.lane.b32.xlu1 %v151_v1, %s195_s19  ;;  %123 = vrot.lane.b32.xlu0 %v37_v0, %s195_s19 }
  0x74   :  { %v39_v4 = vpop.permute.xlu1 %38   ;;  %v22_v5 = vpop.permute.xlu0 %21  }
  0x75   :  { %42 = vst.msk [vmem:[#allocation0 + $0x2] ss:$8 sm:$0xf] %vm4_vm0, %v39_v4   ;;  %44 = vst.msk [vmem:[#allocation0 + $0x2] ss:$8 sm:$0xf0] %vm4_vm0, %v39_v4  }
  0x76   :  { %25 = vst.msk [vmem:[#allocation0 + $0x1] ss:$8 sm:$0xf] %vm4_vm0, %v22_v5   ;;  %27 = vst.msk [vmem:[#allocation0 + $0x1] ss:$8 sm:$0xf0] %vm4_vm0, %v22_v5  }
  0x78   :  { %v48_v6 = vpop.permute.xlu1 %47   ;;  %v31_v7 = vpop.permute.xlu0 %30  }
  0x79   :  { %51 = vst.msk [vmem:[#allocation0 + $0x42] ss:$8 sm:$0xf] %vm4_vm0, %v48_v6   ;;  %53 = vst.msk [vmem:[#allocation0 + $0x42] ss:$8 sm:$0xf0] %vm4_vm0, %v48_v6  }
  0x7a   :  { %34 = vst.msk [vmem:[#allocation0 + $0x41] ss:$8 sm:$0xf] %vm4_vm0, %v31_v7   ;;  %36 = vst.msk [vmem:[#allocation0 + $0x41] ss:$8 sm:$0xf0] %vm4_vm0, %v31_v7  }
  0x7c   :  { %v65_v8 = vpop.permute.xlu1 %64   ;;  %v56_v9 = vpop.permute.xlu0 %55  }
  0x7d   :  { %68 = vst.msk [vmem:[#allocation0 + $0x43] ss:$8 sm:$0xf] %vm4_vm0, %v65_v8   ;;  %70 = vst.msk [vmem:[#allocation0 + $0x43] ss:$8 sm:$0xf0] %vm4_vm0, %v65_v8  }
  0x7e   :  { %59 = vst.msk [vmem:[#allocation0 + $0x3] ss:$8 sm:$0xf] %vm4_vm0, %v56_v9   ;;  %61 = vst.msk [vmem:[#allocation0 + $0x3] ss:$8 sm:$0xf0] %vm4_vm0, %v56_v9  }
  0x80   :  { %v82_v10 = vpop.permute.xlu1 %81   ;;  %v73_v11 = vpop.permute.xlu0 %72  }
  0x81   :  { %85 = vst.msk [vmem:[#allocation0 + $0x44] ss:$8 sm:$0xf] %vm4_vm0, %v82_v10   ;;  %87 = vst.msk [vmem:[#allocation0 + $0x44] ss:$8 sm:$0xf0] %vm4_vm0, %v82_v10  }
  0x82   :  { %76 = vst.msk [vmem:[#allocation0 + $0x4] ss:$8 sm:$0xf] %vm4_vm0, %v73_v11   ;;  %78 = vst.msk [vmem:[#allocation0 + $0x4] ss:$8 sm:$0xf0] %vm4_vm0, %v73_v11  }
  0x84   :  { %v99_v12 = vpop.permute.xlu1 %98   ;;  %v90_v13 = vpop.permute.xlu0 %89  }
  0x85   :  { %102 = vst.msk [vmem:[#allocation0 + $0x45] ss:$8 sm:$0xf] %vm4_vm0, %v99_v12   ;;  %104 = vst.msk [vmem:[#allocation0 + $0x45] ss:$8 sm:$0xf0] %vm4_vm0, %v99_v12  }
  0x86   :  { %93 = vst.msk [vmem:[#allocation0 + $0x5] ss:$8 sm:$0xf] %vm4_vm0, %v90_v13   ;;  %95 = vst.msk [vmem:[#allocation0 + $0x5] ss:$8 sm:$0xf0] %vm4_vm0, %v90_v13  }
  0x88   :  { %v116_v14 = vpop.permute.xlu1 %115   ;;  %v107_v15 = vpop.permute.xlu0 %106  }
  0x89   :  { %119 = vst.msk [vmem:[#allocation0 + $0x46] ss:$8 sm:$0xf] %vm4_vm0, %v116_v14   ;;  %121 = vst.msk [vmem:[#allocation0 + $0x46] ss:$8 sm:$0xf0] %vm4_vm0, %v116_v14  }
  0x8a   :  { %110 = vst.msk [vmem:[#allocation0 + $0x6] ss:$8 sm:$0xf] %vm4_vm0, %v107_v15   ;;  %112 = vst.msk [vmem:[#allocation0 + $0x6] ss:$8 sm:$0xf0] %vm4_vm0, %v107_v15  }
  0x8c   :  { %v133_v16 = vpop.permute.xlu1 %132   ;;  %v124_v17 = vpop.permute.xlu0 %123  }
  0x8d   :  { %136 = vst.msk [vmem:[#allocation0 + $0x47] ss:$8 sm:$0xf] %vm4_vm0, %v133_v16   ;;  %138 = vst.msk [vmem:[#allocation0 + $0x47] ss:$8 sm:$0xf0] %vm4_vm0, %v133_v16  }
  0x8e   :  { %127 = vst.msk [vmem:[#allocation0 + $0x7] ss:$8 sm:$0xf] %vm4_vm0, %v124_v17   ;;  %129 = vst.msk [vmem:[#allocation0 + $0x7] ss:$8 sm:$0xf0] %vm4_vm0, %v124_v17  }
  0x8f   :  { %176 = shalt.err (!%p173_p4)
}
  0x90   :  { %s177_s25 = scalar_lea.hbm %s268_s1, 2048 }
  0x91   :  { %p178_p5 = scmp.ne.s32.totalorder %s268_s1, %s177_s25  ;;  %p181_p6 = scmp.lt.u32.totalorder %s177_s25, %s268_s1 }
  0x93   :  { %p183_p7 = pnand %p181_p6, %p178_p5 }
  0x95   :  { %186 = shalt.err (!%p183_p7)
}
  0x96   :  { %146 = dma.vmem_to_hbm [thread:$0]  %s144_s21, 2048, %s268_s1, [#allocation1]  }
  0x97   :  { %187 = dma.done.wait [#allocation1], 2048  }
  0x98   :  { %188 = vsyncadd [#allocation1], 4294965248 }
  0x99   :  { %148 = vsyncpa [#allocation1], 1 }

// kernel: _fused_forward.1
= control target key start
LH: loop header
LB: loop body
LE: loop exit
PB: predicated region body
PF: predicated region fallthrough
CT: control target
= control target key end

     0   :  { %v741_v3 = vmov 0.0   ;;  %v742_v8 = vmov 0   ;;  %vm35_vm0 = vcmask 1043456   ;;  %vm31_vm1 = vcmask 293888   ;;  %s1009_s0 = inlined_call_operand.vmem [shape: f32[3,2,36,256], index: 0, kind: input, shape index: {}]   ;;  %s1010_s1 = inlined_call_operand.vmem [shape: f32[3,4,36], index: 1, kind: input, shape index: {}]   ;;  %s1011_s2 = inlined_call_operand.vmem [shape: f32[3,4,1], index: 2, kind: input, shape index: {}]   ;;  %s1012_s3 = inlined_call_operand.vmem [shape: f32[3,8,256], index: 3, kind: output, shape index: {}]  }
   0x1   :  { %v17_v0 = vld [vmem:[%s1009_s0 + $0x8] sm:$0xff]  ;;  %v19_v1 = vld [vmem:[%s1009_s0 + $0x18] sm:$0xff]  ;;  %194 = vmatprep.mubr.f32.mxu1 %v741_v3  ;;  %106 = vmatprep.mubr.f32.mxu0 %v741_v3  ;;  %v16_v6 = vld [vmem:[%s1009_s0] sm:$0xff] }
   0x2   :  { %v617_v2 = vld [vmem:[%s1009_s0 + $0x58] sm:$0xff]  ;;  %v689_v4 = vpack.c.bf16 %v19_v1, %v17_v0  ;;  %v619_v5 = vld [vmem:[%s1009_s0 + $0x68] sm:$0xff]  ;;  %v18_v7 = vld [vmem:[%s1009_s0 + $0x10] sm:$0xff]  ;;  %739 = vset.pattern.permute.xlu0 %v742_v8  ;;  %740 = vset.pattern.permute.xlu1 %v742_v8 }
   0x3   :  { %v697_v9 = vpack.c.bf16 %v619_v5, %v617_v2  ;;  %v691_v10 = vpack.c.bf16 %v18_v7, %v16_v6  ;;  %v616_v11 = vld [vmem:[%s1009_s0 + $0x50] sm:$0xff]  ;;  %v618_v12 = vld [vmem:[%s1009_s0 + $0x60] sm:$0xff]  ;;  %v21_v13 = vld [vmem:[%s1009_s0 + $0x28] sm:$0xff] }
   0x4   :  { %690 = vmatprep.subr.bf16.mxu0 %v689_v4  ;;  %v699_v14 = vpack.c.bf16 %v618_v12, %v616_v11  ;;  %v23_v15 = vld [vmem:[%s1009_s0 + $0x38] sm:$0xff]  ;;  %v623_v17 = vld [vmem:[%s1009_s0 + $0x88] sm:$0xff]  ;;  %v20_v20 = vld [vmem:[%s1009_s0 + $0x20] sm:$0xff] }
   0x5   :  { %v621_v16 = vld [vmem:[%s1009_s0 + $0x78] sm:$0xff]  ;;  %698 = vmatprep.subr.bf16.mxu1 %v697_v9  ;;  %692 = vmatpush1.bf16.msra.mxu0 %v691_v10  ;;  %v693_v18 = vpack.c.bf16 %v23_v15, %v21_v13  ;;  %v22_v21 = vld [vmem:[%s1009_s0 + $0x30] sm:$0xff]  ;;  %v622_v24 = vld [vmem:[%s1009_s0 + $0x80] sm:$0xff] }
   0x6   :  { %v701_v19 = vpack.c.bf16 %v623_v17, %v621_v16  ;;  %v620_v22 = vld [vmem:[%s1009_s0 + $0x70] sm:$0xff]  ;;  %700 = vmatpush1.bf16.msra.mxu1 %v699_v14  ;;  %v695_v23 = vpack.c.bf16 %v22_v21, %v20_v20  ;;  %v25_v26 = vld [vmem:[%s1009_s0 + $0x48] sm:$0xf]  ;;  %v625_v27 = vld [vmem:[%s1009_s0 + $0x98] sm:$0xf] }
   0x7   :  { %694 = vmatprep.subr.bf16.mxu0 %v693_v18  ;;  %v703_v25 = vpack.c.bf16 %v622_v24, %v620_v22  ;;  %v24_v28 = vld [vmem:[%s1009_s0 + $0x40] sm:$0xf]  ;;  %v632_v29 = vld [vmem:[%s1009_s0 + $0xa8] sm:$0xff]  ;;  %v634_v30 = vld [vmem:[%s1009_s0 + $0xb8] sm:$0xff] }
   0x8   :  { %702 = vmatprep.subr.bf16.mxu1 %v701_v19  ;;  %v645_v31 = vld [vmem:[%s1009_s0 + $0xf8] sm:$0xff]  ;;  %v624_v32 = vld [vmem:[%s1009_s0 + $0x90] sm:$0xf]  ;;  %v647_v33 = vld [vmem:[%s1009_s0 + $0x108] sm:$0xff]  ;;  %v705_v36 = vpack.c.bf16 %v634_v30, %v632_v29 }
   0x9   :  { %696 = vmatpush1.bf16.msra.mxu0 %v695_v23  ;;  %v631_v34 = vld [vmem:[%s1009_s0 + $0xa0] sm:$0xff]  ;;  %v633_v35 = vld [vmem:[%s1009_s0 + $0xb0] sm:$0xff]  ;;  %v636_v39 = vld [vmem:[%s1009_s0 + $0xc8] sm:$0xff]  ;;  %v713_v40 = vpack.c.bf16 %v647_v33, %v645_v31 }
   0xa   :  { %704 = vmatpush1.bf16.msra.mxu1 %v703_v25  ;;  %613 = vmatprep.subr.msk.mxu0 %vm35_vm0, %v25_v26  ;;  %v644_v37 = vld [vmem:[%s1009_s0 + $0xf0] sm:$0xff]  ;;  %v646_v38 = vld [vmem:[%s1009_s0 + $0x100] sm:$0xff]  ;;  %v638_v41 = vld [vmem:[%s1009_s0 + $0xd8] sm:$0xff]  ;;  %v707_v46 = vpack.c.bf16 %v633_v35, %v631_v34 }
   0xb   :  { %626 = vmatprep.subr.msk.mxu1 %vm35_vm0, %v625_v27  ;;  %v649_v42 = vld [vmem:[%s1009_s0 + $0x118] sm:$0xff]  ;;  %v651_v43 = vld [vmem:[%s1009_s0 + $0x128] sm:$0xff]  ;;  %v14_v44 = vld [vmem:[%s1010_s1] sm:$0xf]  ;;  %v715_v45 = vpack.c.bf16 %v646_v38, %v644_v37  ;;  %v709_v50 = vpack.c.bf16 %v638_v41, %v636_v39 }
   0xc   :  { %v717_v47 = vpack.c.bf16 %v651_v43, %v649_v42  ;;  %v648_v48 = vld [vmem:[%s1009_s0 + $0x110] sm:$0xff]  ;;  %v650_v49 = vld [vmem:[%s1009_s0 + $0x120] sm:$0xff]  ;;  %v640_v55 = vld [vmem:[%s1009_s0 + $0xe8] sm:$0xf] }
   0xd   :  { %614 = vmatpush1.msk.msra.mxu0 %vm35_vm0, %v24_v28  ;;  %v635_v51 = vld [vmem:[%s1009_s0 + $0xc0] sm:$0xff]  ;;  %v637_v52 = vld [vmem:[%s1009_s0 + $0xd0] sm:$0xff]  ;;  %v719_v53 = vpack.c.bf16 %v650_v49, %v648_v48  ;;  %v653_v56 = vld [vmem:[%s1009_s0 + $0x138] sm:$0xf] }
   0xe   :  { %627 = vmatpush1.msk.msra.mxu1 %vm35_vm0, %v624_v32  ;;  %706 = vmatprep.subr.bf16.mxu0 %v705_v36  ;;  %v711_v54 = vpack.c.bf16 %v637_v52, %v635_v51  ;;  %v662_v57 = vld [vmem:[%s1009_s0 + $0x148] sm:$0xff]  ;;  %v664_v58 = vld [vmem:[%s1009_s0 + $0x158] sm:$0xff]  ;;  %v652_v59 = vld [vmem:[%s1009_s0 + $0x130] sm:$0xf] }
   0xf   :  { %628 = vmatmul.mubr.msk.f32.vlgmr.msra.gmra.mrb[0].mxu1 %vm31_vm1, %v14_v44  ;;  %714 = vmatprep.subr.bf16.mxu1 %v713_v40  ;;  %v675_v60 = vld [vmem:[%s1009_s0 + $0x198] sm:$0xff]  ;;  %v677_v61 = vld [vmem:[%s1009_s0 + $0x1a8] sm:$0xff]  ;;  %v661_v62 = vld [vmem:[%s1009_s0 + $0x140] sm:$0xff]  ;;  %v721_v8 = vpack.c.bf16 %v664_v58, %v662_v57 }
  0x10   :  { %615 = vmatmul.mubr.msk.f32.vlgmr.msra.gmra.mrb[0].mxu0 %vm31_vm1, %v14_v44  ;;  %716 = vmatpush1.bf16.msra.mxu1 %v715_v45  ;;  %v639_v63 = vld [vmem:[%s1009_s0 + $0xe0] sm:$0xf]  ;;  %v629_v0 = vld [vmem:[%s1010_s1 + $0x4] sm:$0xf]  ;;  %v663_v1 = vld [vmem:[%s1009_s0 + $0x150] sm:$0xff]  ;;  %v729_v9 = vpack.c.bf16 %v677_v61, %v675_v60 }
  0x11   :  { %708 = vmatpush1.bf16.msra.mxu0 %v707_v46  ;;  %718 = vmatprep.subr.bf16.mxu1 %v717_v47  ;;  %v674_v2 = vld [vmem:[%s1009_s0 + $0x190] sm:$0xff]  ;;  %v676_v4 = vld [vmem:[%s1009_s0 + $0x1a0] sm:$0xff]  ;;  %v666_v5 = vld [vmem:[%s1009_s0 + $0x168] sm:$0xff]  ;;  %v723_v14 = vpack.c.bf16 %v663_v1, %v661_v62 }
  0x12   :  { %710 = vmatprep.subr.bf16.mxu0 %v709_v50  ;;  %392 = vmatprep.mubr.f32.mxu1 %v741_v3  ;;  %v679_v6 = vld [vmem:[%s1009_s0 + $0x1b8] sm:$0xff]  ;;  %v681_v7 = vld [vmem:[%s1009_s0 + $0x1c8] sm:$0xff]  ;;  %v15_v11 = vld [vmem:[%s1011_s2] sm:$0xf]  ;;  %v731_v13 = vpack.c.bf16 %v676_v4, %v674_v2 }
  0x13   :  { %304 = vmatprep.mubr.f32.mxu0 %v741_v3  ;;  %v668_v10 = vld [vmem:[%s1009_s0 + $0x178] sm:$0xff]  ;;  %v660_v12 = vld [vmem:[%s1011_s2 + $0x8] sm:$0xf]  ;;  %28 = vperm.xlu0 %739, %v15_v11   ;;  %v733_v15 = vpack.c.bf16 %v681_v7, %v679_v6  ;;  %v678_v16 = vld [vmem:[%s1009_s0 + $0x1b0] sm:$0xff] }
  0x14   :  { %720 = vmatpush1.bf16.msra.mxu1 %v719_v53  ;;  %427 = vperm.xlu1 %740, %v660_v12   ;;  %v680_v17 = vld [vmem:[%s1009_s0 + $0x1c0] sm:$0xff]  ;;  %v725_v18 = vpack.c.bf16 %v668_v10, %v666_v5  ;;  %v667_v20 = vld [vmem:[%s1009_s0 + $0x170] sm:$0xff]  ;;  %v683_v24 = vld [vmem:[%s1009_s0 + $0x1d8] sm:$0xf] }
  0x15   :  { %712 = vmatpush1.bf16.msra.mxu0 %v711_v54  ;;  %654 = vmatprep.subr.msk.mxu1 %vm35_vm0, %v653_v56  ;;  %v665_v19 = vld [vmem:[%s1009_s0 + $0x160] sm:$0xff]  ;;  %v735_v21 = vpack.c.bf16 %v680_v17, %v678_v16  ;;  %v670_v25 = vld [vmem:[%s1009_s0 + $0x188] sm:$0xf]  ;;  %v682_v26 = vld [vmem:[%s1009_s0 + $0x1d0] sm:$0xf] }
  0x16   :  { %641 = vmatprep.subr.msk.mxu0 %vm35_vm0, %v640_v55  ;;  %v630_v22 = vld [vmem:[%s1011_s2 + $0x4] sm:$0xf]  ;;  %v727_v23 = vpack.c.bf16 %v667_v20, %v665_v19  ;;  %v669_v27 = vld [vmem:[%s1009_s0 + $0x180] sm:$0xf]  ;;  %v659_v28 = vld [vmem:[%s1010_s1 + $0x8] sm:$0xf] }
  0x17   :  { %228 = vperm.xlu0 %739, %v630_v22  }
  0x18   :  { %655 = vmatpush1.msk.msra.mxu1 %vm35_vm0, %v652_v59 }
  0x19   :  { %642 = vmatpush1.msk.msra.mxu0 %vm35_vm0, %v639_v63  ;;  %656 = vmatmul.mubr.msk.f32.vlgmr.msra.gmra.mrb[2].mxu1 %vm31_vm1, %v629_v0 }
  0x1a   :  { %722 = vmatprep.subr.bf16.mxu0 %v721_v8  ;;  %730 = vmatprep.subr.bf16.mxu1 %v729_v9 }
  0x1b   :  { %643 = vmatmul.mubr.msk.f32.vlgmr.msra.gmra.mrb[2].mxu0 %vm31_vm1, %v629_v0  ;;  %732 = vmatpush1.bf16.msra.mxu1 %v731_v13 }
  0x1c   :  { %724 = vmatpush1.bf16.msra.mxu0 %v723_v14  ;;  %734 = vmatprep.subr.bf16.mxu1 %v733_v15 }
  0x1d   :  { %726 = vmatprep.subr.bf16.mxu0 %v725_v18  ;;  %503 = vmatprep.mubr.f32.mxu0 %v741_v3 }
  0x1e   :  { %591 = vmatprep.mubr.f32.mxu1 %v741_v3 }
  0x1f   :  { %736 = vmatpush1.bf16.msra.mxu1 %v735_v21 }
  0x20   :  { %728 = vmatpush1.bf16.msra.mxu0 %v727_v23  ;;  %684 = vmatprep.subr.msk.mxu1 %vm35_vm0, %v683_v24 }
  0x21   :  { %671 = vmatprep.subr.msk.mxu0 %vm35_vm0, %v670_v25 }
  0x23   :  { %685 = vmatpush1.msk.msra.mxu1 %vm35_vm0, %v682_v26 }
  0x24   :  { %672 = vmatpush1.msk.msra.mxu0 %vm35_vm0, %v669_v27  ;;  %686 = vmatmul.mubr.msk.f32.vlgmr.msra.gmra.mrb[4].mxu1 %vm31_vm1, %v659_v28 }
  0x25   :  { %673 = vmatmul.mubr.msk.f32.vlgmr.msra.gmra.mrb[4].mxu0 %vm31_vm1, %v659_v28 }
  0x92   :  { %v29_v3 = vpop.permute.xlu0 %28 }
  0x93   :  { %v428_v54 = vpop.permute.xlu1 %427 }
  0x96   :  { %v229_v41 = vpop.permute.xlu0 %228 }
  0xe2   :  { %v196_v29 = vpop.f32.mrb[0].mxu1 }
  0xe3   :  { %v197_v30 = vadd.f32 %v196_v29, %v29_v3  ;;  %v198_v31 = vpop.f32.mrb[1].mxu1  ;;  %v108_v32 = vpop.f32.mrb[0].mxu0 }
  0xe4   :  { %v199_v33 = vadd.f32 %v198_v31, %v29_v3  ;;  %v109_v34 = vadd.f32 %v108_v32, %v29_v3  ;;  %v110_v35 = vpop.f32.mrb[1].mxu0 }
  0xe5   :  { %v203_v36 = vrot.slane %v197_v30, 4  ;;  %v111_v37 = vadd.f32 %v110_v35, %v29_v3 }
  0xe6   :  { %v204_v38 = vrot.slane %v199_v33, 4 }
  0xe7   :  { %v207_v39 = vsel %vm35_vm0, %v109_v34, %v203_v36 }
  0xe8   :  { %209 = vst [vmem:[%s1012_s3] sm:$0xff] %v207_v39  ;;  %v208_v40 = vsel %vm35_vm0, %v111_v37, %v204_v38 }
  0xe9   :  { %210 = vst [vmem:[%s1012_s3 + $0x8] sm:$0xff] %v208_v40 }
  0xec   :  { %v394_v42 = vpop.f32.mrb[2].mxu1 }
  0xed   :  { %v395_v43 = vadd.f32 %v394_v42, %v229_v41  ;;  %v396_v44 = vpop.f32.mrb[3].mxu1 }
  0xee   :  { %v397_v45 = vadd.f32 %v396_v44, %v229_v41  ;;  %v306_v46 = vpop.f32.mrb[2].mxu0 }
  0xef   :  { %v401_v47 = vrot.slane %v395_v43, 4  ;;  %v307_v48 = vadd.f32 %v306_v46, %v229_v41  ;;  %v308_v49 = vpop.f32.mrb[3].mxu0 }
  0xf0   :  { %v402_v50 = vrot.slane %v397_v45, 4  ;;  %v309_v51 = vadd.f32 %v308_v49, %v229_v41 }
  0xf1   :  { %v405_v52 = vsel %vm35_vm0, %v307_v48, %v401_v47 }
  0xf2   :  { %657 = vst [vmem:[%s1012_s3 + $0x10] sm:$0xff] %v405_v52  ;;  %v406_v53 = vsel %vm35_vm0, %v309_v51, %v402_v50 }
  0xf3   :  { %658 = vst [vmem:[%s1012_s3 + $0x18] sm:$0xff] %v406_v53 }
  0xf7   :  { %v593_v55 = vpop.f32.mrb[4].mxu1 }
  0xf8   :  { %v505_v56 = vpop.f32.mrb[4].mxu0  ;;  %v594_v57 = vadd.f32 %v593_v55, %v428_v54  ;;  %v595_v58 = vpop.f32.mrb[5].mxu1 }
  0xf9   :  { %v506_v59 = vadd.f32 %v505_v56, %v428_v54  ;;  %v507_v60 = vpop.f32.mrb[5].mxu0  ;;  %v596_v61 = vadd.f32 %v595_v58, %v428_v54 }
  0xfa   :  { %v600_v62 = vrot.slane %v594_v57, 4  ;;  %v508_v63 = vadd.f32 %v507_v60, %v428_v54 }
  0xfb   :  { %v601_v0 = vrot.slane %v596_v61, 4 }
  0xfc   :  { %v604_v1 = vsel %vm35_vm0, %v506_v59, %v600_v62 }
  0xfd   :  { %687 = vst [vmem:[%s1012_s3 + $0x20] sm:$0xff] %v604_v1  ;;  %v605_v2 = vsel %vm35_vm0, %v508_v63, %v601_v0 }
  0xfe   :  { %688 = vst [vmem:[%s1012_s3 + $0x28] sm:$0xff] %v605_v2 }

</bundles_post_ra>
